<compile_context>
chip_gen: v7x
topology: tpu7x:2x2x1
jax: 0.10.0
libtpu: 0.0.40
codegen_flags: <defaults>
</compile_context>

<pallas_src>
import functools

import jax
import jax.numpy as jnp
from jax.experimental import pallas as pl
from jax.experimental.pallas import tpu as pltpu


NODE_SIZE = 207          # hard-coded in the PyTorch module (METR-LA)
V_PAD = 256              # node axis zero-padded to a multiple of 128 (lane axis)
RESOLUTION = 12          # -> 288 / 12 = 24 time slots
SYMETRIC = True
HAS_SELF_LOOP = True
EDGE_SIZE = 64           # synthetic edge list (csv not read; deterministic instead)
N_SLOTS = 288 // RESOLUTION

# Batch elements per grid step.  Per-step VMEM for x/out is
# 2 (dbl-buf) * 2 (arrays) * block_b * 16 * 256 * 4 B = block_b * 64 KiB,
# i.e. 2 MiB at block_b=32 -- small next to the ~12 MiB resident operator
# table, and step overhead (~0.35 us) is amortized over ~32 matmuls.
MAX_BLOCK_B = 32

# VMEM budget (all generations): operator table 6 MiB (x2 pipeline buffers)
# + bias/scale tables ~0.1 MiB + x/out ~2 MiB  ->  ~14.5 MiB.  Set the scoped
# limit explicitly so v5e (16 MiB default) compiles and v7x (64 MiB physical)
# keeps headroom.
VMEM_LIMIT_BYTES = 40 * 1024 * 1024


# ----------------------------------------------------------------------------
# Pallas kernel.  Per grid step, for each of block_b batch elements i:
#   slot = slot_ref[base + i]                 (SMEM scalar-prefetch read)
#   out_T[l, w] = sum_v x_T[l, v] * At[slot, v, w]
#                 + bias[slot, w] + (1 + sloop[slot, w]) * x_T[l, w]
# The 24-slot operator/bias/scale tables are VMEM-resident (constant block).
# ----------------------------------------------------------------------------
def _diffusion_gcn_kernel(slot_ref, a_ref, b_ref, s_ref, x_ref, o_ref, *,
                          block_b):
    # slot_ref: (N,)            SMEM, int32 time slots (scalar prefetch)
    # a_ref:    (S, Vp, Vp)     VMEM-resident transposed graph operator table
    # b_ref:    (S, 1,  Vp)     lane-dense bias table
    # s_ref:    (S, 1,  Vp)     lane-dense (1 + self_loop) scale table
    # x_ref:    (block_b, L, Vp) inputs, nodes on lanes
    # o_ref:    (block_b, L, Vp)
    base = pl.program_id(0) * block_b

    def body(i, carry):
        slot = slot_ref[base + i]
        xi = x_ref[i]                                         # (L, Vp)
        acc = jnp.dot(xi, a_ref[slot],                        # (L, Vp)@(Vp, Vp)
                      preferred_element_type=jnp.float32)
        # residual + self-loop + bias on the VPU (un-folded from A's diagonal)
        o_ref[i] = (acc + b_ref[slot] + s_ref[slot] * xi).astype(o_ref.dtype)
        return carry

    jax.lax.fori_loop(0, block_b, body, 0)


def _pick_block_batch(n):
    """Largest divisor of n <= MAX_BLOCK_B that keeps >=2 grid steps (megacore)."""
    best = 1
    for b in range(1, min(MAX_BLOCK_B, n) + 1):
        if n % b == 0 and (n // b >= 2 or n == 1):
            best = b
    return best


def diffusion_gcn_pallas(slot, a_tbl, bias_tbl, scale_tbl, x_t, *, block_b):
    """slot:[N] i32, a_tbl:[S,Vp,Vp], bias/scale:[S,1,Vp], x_t:[N,L,Vp] -> [N,L,Vp]."""
    N, L, Vp = x_t.shape
    S = a_tbl.shape[0]
    assert N % block_b == 0
    kernel = functools.partial(_diffusion_gcn_kernel, block_b=block_b)
    return pl.pallas_call(
        kernel,
        out_shape=jax.ShapeDtypeStruct((N, L, Vp), x_t.dtype),
        grid_spec=pltpu.PrefetchScalarGridSpec(
            num_scalar_prefetch=1,               # `slot` lands in SMEM
            grid=(N // block_b,),
            in_specs=[
                # VMEM-resident tables: constant block index -> DMA'd once,
                # never re-fetched across grid steps.
                pl.BlockSpec((S, Vp, Vp), lambda n, slot_ref: (0, 0, 0)),
                pl.BlockSpec((S, 1, Vp), lambda n, slot_ref: (0, 0, 0)),
                pl.BlockSpec((S, 1, Vp), lambda n, slot_ref: (0, 0, 0)),
                # streamed per-step inputs
                pl.BlockSpec((block_b, L, Vp), lambda n, slot_ref: (n, 0, 0)),
            ],
            out_specs=pl.BlockSpec((block_b, L, Vp), lambda n, slot_ref: (n, 0, 0)),
        ),
        compiler_params=pltpu.CompilerParams(
            dimension_semantics=("parallel",),
            vmem_limit_bytes=VMEM_LIMIT_BYTES),
    )(slot, a_tbl, bias_tbl, scale_tbl, x_t)


# ----------------------------------------------------------------------------
# Parameter / operator-table construction (glue, plain JAX).
# Mirrors diffusion_gcn.__init__ / diff_weight_construct / diff_bias_construct.
# ----------------------------------------------------------------------------
def make_params(key):
    k_i, k_j, k_w, k_b, k_s = jax.random.split(key, 5)
    # TODO(synk): the PyTorch module reads the edge list from a csv; we use a
    # deterministic synthetic edge list instead (no file I/O allowed here).
    edge_i = jax.random.randint(k_i, (EDGE_SIZE,), 0, NODE_SIZE)
    edge_j = jax.random.randint(k_j, (EDGE_SIZE,), 0, NODE_SIZE)
    n_wd_rows = N_SLOTS if SYMETRIC else 2 * N_SLOTS
    weight_diff = jax.random.normal(k_w, (n_wd_rows, EDGE_SIZE), jnp.float32) / 1000.0
    bias_diffusion = jax.random.normal(k_b, (N_SLOTS, NODE_SIZE), jnp.float32) / 10.0
    weight_self_loop = jax.random.normal(k_s, (N_SLOTS, NODE_SIZE), jnp.float32) / 10.0
    return dict(edge_i=edge_i, edge_j=edge_j, weight_diff=weight_diff,
                bias_diffusion=bias_diffusion, weight_self_loop=weight_self_loop)


def _build_one_operator(w_edges, edge_i, edge_j):
    # dense adjacency via scatter-add (== torch.sparse_coo_tensor(...).to_dense(),
    # which coalesces duplicate indices by summation)
    if SYMETRIC:
        rows = jnp.concatenate([edge_i, edge_j])
        cols = jnp.concatenate([edge_j, edge_i])
        vals = jnp.concatenate([w_edges, w_edges])
    else:
        rows, cols, vals = edge_i, edge_j, w_edges
    W = jnp.zeros((NODE_SIZE, NODE_SIZE), jnp.float32).at[rows, cols].add(vals)
    # torch.sum(dense[None], 1)[0, :] sums over the row axis -> column sums
    col_sum = W.sum(axis=0)
    return jnp.diag(col_sum) - W


def build_operator_tables(params):
    """Precompute per-slot tables once (hoisted out of the hot path).

    Returns:
      a_table:     [N_SLOTS, Vp, Vp]  transposed graph operator (no folding),
                                      zero-padded to Vp.
      bias_table:  [N_SLOTS, 1, Vp]   lane-dense bias, zero-padded.
      scale_table: [N_SLOTS, 1, Vp]   lane-dense (1 + self_loop), zero-padded.
    """
    wd = params["weight_diff"][:N_SLOTS]
    build = jax.vmap(
        lambda w: _build_one_operator(w, params["edge_i"], params["edge_j"]))
    A = build(wd)                                              # [S, V, V]
    # transpose so the contraction axis (v) is on sublanes and the output node
    # axis (w) is on lanes, then zero-pad V -> Vp (padded rows/cols are zero,
    # so padded output lanes are exactly zero and get sliced off).
    A_t = jnp.swapaxes(A, 1, 2)
    pad = V_PAD - NODE_SIZE
    A_t = jnp.pad(A_t, ((0, 0), (0, pad), (0, pad)))           # [S, Vp, Vp]
    bias = jnp.pad(params["bias_diffusion"], ((0, 0), (0, pad)))[:, None, :]
    if HAS_SELF_LOOP:
        scale = 1.0 + params["weight_self_loop"]               # residual + self-loop
    else:
        scale = jnp.ones((N_SLOTS, NODE_SIZE), jnp.float32)    # residual only
    scale = jnp.pad(scale, ((0, 0), (0, pad)))[:, None, :]
    return A_t, bias, scale


def diffusion_gcn_forward(tables, inputs, ind):
    """inputs: [N, C, V, L] (as in the PyTorch module); ind: [N] int -> [N, V, L]."""
    a_table, bias_table, scale_table = tables
    x = inputs[:, 0, :, :]                                     # [N, V, L]
    N, V, L = x.shape
    slot = (ind // RESOLUTION).astype(jnp.int32)               # [N] scalar prefetch
    # layout plumbing: nodes onto the lane axis, zero-pad to Vp
    x_t = jnp.swapaxes(x, 1, 2)                                # [N, L, V]
    x_t = jnp.pad(x_t, ((0, 0), (0, 0), (0, V_PAD - V)))       # [N, L, Vp]
    block_b = _pick_block_batch(N)
    out_t = diffusion_gcn_pallas(slot, a_table, bias_table, scale_table, x_t,
                                 block_b=block_b)              # [N, L, Vp]
    return jnp.swapaxes(out_t[:, :, :V], 1, 2)                 # [N, V, L]


# ----------------------------------------------------------------------------
# Pure-JAX reference mirroring the PyTorch forward exactly.
# ----------------------------------------------------------------------------
def diffusion_gcn_reference(params, inputs, ind):
    x = inputs[:, 0, :, :]
    ii = ind // RESOLUTION
    build = jax.vmap(
        lambda w: _build_one_operator(w, params["edge_i"], params["edge_j"]))
    A = build(params["weight_diff"][ii])                       # [N, V, V]
    bias = params["bias_diffusion"][ii][:, :, None]            # [N, V, 1]
    diffusion = jnp.einsum('nvl,nwv->nwl', x, A,
                           precision=jax.lax.Precision.HIGHEST) + bias
    if HAS_SELF_LOOP:
        sloop = params["weight_self_loop"][ii][:, :, None]
        return diffusion + x + sloop * x
    return diffusion + x


if __name__ == "__main__":
    key = jax.random.PRNGKey(0)
    k_params, k_in = jax.random.split(key)
    params = make_params(k_params)
    tables = build_operator_tables(params)        # built once, reused per forward

    N, C, V, L = 2, 2, NODE_SIZE, 12
    inputs = jax.random.normal(k_in, (N, C, V, L), jnp.float32)
    ind = jnp.array([5, 130], dtype=jnp.int32)    # time-of-day indices in [0, 288)

    fwd = jax.jit(functools.partial(diffusion_gcn_forward, tables))
    out = jax.block_until_ready(fwd(inputs, ind))

    ref = diffusion_gcn_reference(params, inputs, ind)
    assert out.shape == (N, V, L)
    # Residual/self-loop now stay on the VPU in exact f32; only the small
    # (~1e-3-scale) graph term goes through the MXU, so tolerance is tight.
    err = float(jnp.max(jnp.abs(out - ref)))
    assert jnp.allclose(out, ref, atol=1e-4, rtol=1e-4), err
    print("KERNEL_OK")
</pallas_src>

<mosaic_0001>
module attributes {stable_mosaic.version = 11 : i64} {
  func.func @_diffusion_gcn_kernel(%arg0: i32, %arg1: memref<2xi32, #tpu.memory_space<smem>>, %arg2: memref<24x256x256xf32, #tpu.memory_space<vmem>>, %arg3: memref<24x1x256xf32, #tpu.memory_space<vmem>>, %arg4: memref<24x1x256xf32, #tpu.memory_space<vmem>>, %arg5: memref<1x12x256xf32, #tpu.memory_space<vmem>>, %arg6: memref<1x12x256xf32, #tpu.memory_space<vmem>>) attributes {dimension_semantics = [#tpu.dimension_semantics<parallel>], iteration_bounds = array<i64: 2>, scalar_prefetch = 1 : i64, scratch_operands = 0 : i64, tpu.core_type = #tpu.core_type<tc>, window_params = [{pipeline_mode = #tpu.pipeline_mode<synchronous>, transform_indices = @transform_0, window_bounds = array<i64: 24, 256, 256>}, {pipeline_mode = #tpu.pipeline_mode<synchronous>, transform_indices = @transform_1, window_bounds = array<i64: 24, 1, 256>}, {pipeline_mode = #tpu.pipeline_mode<synchronous>, transform_indices = @transform_2, window_bounds = array<i64: 24, 1, 256>}, {transform_indices = @transform_3, window_bounds = array<i64: 1, 12, 256>}, {transform_indices = @transform_4, window_bounds = array<i64: 1, 12, 256>}]} {
    %c1_i32 = arith.constant 1 : i32
    %0 = arith.muli %arg0, %c1_i32 : i32
    %c0_i32 = arith.constant 0 : i32
    %1 = arith.addi %0, %c0_i32 : i32
    %2 = arith.index_cast %1 : i32 to index
    %3 = memref.load %arg1[%2] : memref<2xi32, #tpu.memory_space<smem>>
    %4 = arith.index_cast %c0_i32 : i32 to index
    %c0 = arith.constant 0 : index
    %c0_0 = arith.constant 0 : index
    %5 = vector.load %arg5[%4, %c0, %c0_0] : memref<1x12x256xf32, #tpu.memory_space<vmem>>, vector<1x12x256xf32>
    %6 = vector.shape_cast %5 : vector<1x12x256xf32> to vector<12x256xf32>
    %7 = arith.index_cast %3 : i32 to index
    %c0_1 = arith.constant 0 : index
    %c0_2 = arith.constant 0 : index
    %8 = vector.load %arg2[%7, %c0_1, %c0_2] : memref<24x256x256xf32, #tpu.memory_space<vmem>>, vector<1x256x256xf32>
    %9 = vector.shape_cast %8 : vector<1x256x256xf32> to vector<256x256xf32>
    %cst = arith.constant dense<0.000000e+00> : vector<12x256xf32>
    %10 = tpu.matmul %6, %9, %cst {dimension_numbers = #tpu.dot_dimension_numbers<[1], [0], [0], [1], [0, 0, 1, 1], [], []>} : vector<12x256xf32>, vector<256x256xf32>, vector<12x256xf32> -> vector<12x256xf32>
    %11 = arith.index_cast %3 : i32 to index
    %c0_3 = arith.constant 0 : index
    %c0_4 = arith.constant 0 : index
    %12 = vector.load %arg3[%11, %c0_3, %c0_4] : memref<24x1x256xf32, #tpu.memory_space<vmem>>, vector<1x1x256xf32>
    %13 = vector.shape_cast %12 : vector<1x1x256xf32> to vector<1x256xf32>
    %14 = vector.broadcast %13 : vector<1x256xf32> to vector<12x256xf32>
    %15 = arith.addf %10, %14 : vector<12x256xf32>
    %16 = arith.index_cast %3 : i32 to index
    %c0_5 = arith.constant 0 : index
    %c0_6 = arith.constant 0 : index
    %17 = vector.load %arg4[%16, %c0_5, %c0_6] : memref<24x1x256xf32, #tpu.memory_space<vmem>>, vector<1x1x256xf32>
    %18 = vector.shape_cast %17 : vector<1x1x256xf32> to vector<1x256xf32>
    %19 = vector.broadcast %18 : vector<1x256xf32> to vector<12x256xf32>
    %20 = arith.mulf %19, %6 : vector<12x256xf32>
    %21 = arith.addf %15, %20 : vector<12x256xf32>
    %22 = arith.index_cast %c0_i32 : i32 to index
    %c0_7 = arith.constant 0 : index
    %c0_8 = arith.constant 0 : index
    %23 = vector.load %arg6[%22, %c0_7, %c0_8] : memref<1x12x256xf32, #tpu.memory_space<vmem>>, vector<1x12x256xf32>
    %24 = vector.shape_cast %23 : vector<1x12x256xf32> to vector<12x256xf32>
    %25 = vector.shape_cast %21 : vector<12x256xf32> to vector<1x12x256xf32>
    tpu.vector_store %arg6[%22, %c0_7, %c0_8], %25 {strides = array<i32>} : memref<1x12x256xf32, #tpu.memory_space<vmem>>, vector<1x12x256xf32>,
    %c1_i32_9 = arith.constant 1 : i32
    return
  }
  func.func @transform_0(%arg0: i32, %arg1: memref<2xi32, #tpu.memory_space<smem>>) -> (i32, i32, i32) {
    %c0_i32 = arith.constant 0 : i32
    %c0_i32_0 = arith.constant 0 : i32
    %c0_i32_1 = arith.constant 0 : i32
    %c0_i32_2 = arith.constant 0 : i32
    return %c0_i32, %c0_i32_0, %c0_i32_1 : i32, i32, i32
  }
  func.func @transform_1(%arg0: i32, %arg1: memref<2xi32, #tpu.memory_space<smem>>) -> (i32, i32, i32) {
    %c0_i32 = arith.constant 0 : i32
    %c0_i32_0 = arith.constant 0 : i32
    %c0_i32_1 = arith.constant 0 : i32
    %c0_i32_2 = arith.constant 0 : i32
    return %c0_i32, %c0_i32_0, %c0_i32_1 : i32, i32, i32
  }
  func.func @transform_2(%arg0: i32, %arg1: memref<2xi32, #tpu.memory_space<smem>>) -> (i32, i32, i32) {
    %c0_i32 = arith.constant 0 : i32
    %c0_i32_0 = arith.constant 0 : i32
    %c0_i32_1 = arith.constant 0 : i32
    %c0_i32_2 = arith.constant 0 : i32
    return %c0_i32, %c0_i32_0, %c0_i32_1 : i32, i32, i32
  }
  func.func @transform_3(%arg0: i32, %arg1: memref<2xi32, #tpu.memory_space<smem>>) -> (i32, i32, i32) {
    %c0_i32 = arith.constant 0 : i32
    %c0_i32_0 = arith.constant 0 : i32
    %c0_i32_1 = arith.constant 0 : i32
    return %arg0, %c0_i32, %c0_i32_0 : i32, i32, i32
  }
  func.func @transform_4(%arg0: i32, %arg1: memref<2xi32, #tpu.memory_space<smem>>) -> (i32, i32, i32) {
    %c0_i32 = arith.constant 0 : i32
    %c0_i32_0 = arith.constant 0 : i32
    %c0_i32_1 = arith.constant 0 : i32
    return %arg0, %c0_i32, %c0_i32_0 : i32, i32, i32
  }
}

</mosaic_0001>

<bundles_post_ra>
// kernel: diffusion_gcn_forward.1
= control target key start
LH: loop header
LB: loop body
LE: loop exit
PB: predicated region body
PF: predicated region fallthrough
CT: control target
= control target key end

     0   :  { %s1102_s0 = inlined_call_operand.vmem [shape: s32[2], index: 0, kind: input, shape index: {}]   ;;  %s1103_s1 = inlined_call_operand.hbm [shape: f32[24,256,256], index: 1, kind: input, shape index: {}]   ;;  %s1104_s2 = inlined_call_operand.hbm [shape: f32[24,1,256], index: 2, kind: input, shape index: {}]   ;;  %s1105_s3 = inlined_call_operand.hbm [shape: f32[24,1,256], index: 3, kind: input, shape index: {}]   ;;  %s1106_s4 = inlined_call_operand.vmem [shape: f32[2,12,256], index: 4, kind: input, shape index: {}]   ;;  %s1107_s5 = inlined_call_operand.vmem [shape: f32[2,12,256], index: 5, kind: output, shape index: {}]  }
   0x1   :  { %s10_s20 = sshll.u32 %s1102_s0, 4  ;;  %s11_s20 = int_to_ptr.vmem [resolvable:$true] %s10_s20 }
   0x2   :  { %s692_s21 = scalar_lea.vmem %s11_s20, 16  ;;  %p697_p1 = scmp.lt.s32.totalorder %s11_s20, %s11_s20 }
   0x3   :  { %p693_p0 = scmp.ne.s32.totalorder %s11_s20, %s692_s21  ;;  %p698_p2 = scmp.lt.s32.totalorder %s692_s21, %s692_s21 }
   0x5   :  { %p699_p3 = por %p698_p2, %p697_p1 }
   0x7   :  { %p700_p4 = pnand %p699_p3, %p693_p0 }
   0x9   :  { %703 = shalt.err (!%p700_p4)  }
   0xa   :  { %s806_s22 = smov [#allocation3]  }
   0xb   :  { %13 = dma.vmem_to_smem %s11_s20, 16, %s806_s22, [#allocation2] }
   0xc   :  { %792 = dma.done.wait [#allocation2], 16 }
   0xd   :  { %793 = vsyncadd [#allocation2], 4294967280 }
   0xe   :  { %15 = sfence }
   0xf   :  { %16 = vsyncpa [#allocation5], 0 }
  0x10   :  { %17 = vsyncpa [#allocation7], 0  ;;  %s847_s23 = smov 0  }
  0x11 LB: > { %s807_s0 = smov [#allocation6]   ;;  %s853_s25 = sadd.s32 4294967295, %s804_s23   ;;  %s804_s23 = sphi %s847_s23, %s23_s23  }
  0x12   : > { %s168_s24 = sshll.u32 %s807_s0, 4  ;;  %p531_p5 = scmp.ge.s32.totalorder %s804_s23, 1  ;;  %s862_s24 = int_to_ptr.vmem [resolvable:$true] %s168_s24 }
  0x13   : > { %p143_p6 = scmp.lt.s32.totalorder %s804_s23, 3  ;;  %p1108_p7 = scmp.eq.s32.totalorder %s853_s25, 0 }
  0x14   : > { %s808_s27 = smov [#allocation4]   ;;  %s809_s30 = smov [#allocation8]  }
  0x15   : > { %p858_p8 = pnand %p531_p5, %p143_p6  ;;  %s155_s28 = sshll.u32 %s808_s27, 4  ;;  %s866_s28 = int_to_ptr.vmem [resolvable:$true] %s155_s28 }
  0x16   : > { %s874_s6 = sshll.u32 %s809_s30, 4  ;;  %s704_s9 = scalar_lea.hbm %s1104_s2, 768  ;;  %s182_s6 = int_to_ptr.vmem [resolvable:$true] %s874_s6 }
  0x17   : > { %s1110_s26 = scalar_select %p858_p8, 1, 0 }
  0x18   : > { %p660_p9 = pneg %p858_p8  ;;  %p705_p11 = scmp.ne.s32.totalorder %s1104_s2, %s704_s9 }
  0x19   : > { %p711_p1 = scmp.lt.u32.totalorder %s704_s9, %s1104_s2 }
  0x1a   : > { %p870_p10 = pnand %p1108_p7, %p660_p9 }
  0x1c   : > { %p884_p12 = pneg %p870_p10 }
  0x1e   : > { %p707_p13 = pnand %p884_p12, %p705_p11 }
  0x20   : > { %p708_p0 = pneg %p707_p13 }
  0x22   : > { %p713_p2 = pnand %p711_p1, %p708_p0 }
  0x24   : > { %716 = shalt.err (!%p713_p2)
}
  0x25   : > { %s717_s15 = scalar_lea.vmem %s862_s24, 768  ;;  %p725_p6 = scmp.lt.s32.totalorder %s862_s24, %s862_s24 }
  0x26   : > { %p718_p3 = scmp.ne.s32.totalorder %s862_s24, %s717_s15  ;;  %p726_p9 = scmp.lt.s32.totalorder %s717_s15, %s717_s15 }
  0x28   : > { %p720_p4 = pnand %p718_p3, %p884_p12  ;;  %p727_p11 = por %p726_p9, %p725_p6 }
  0x2a   : > { %p721_p5 = pneg %p720_p4 }
  0x2c   : > { %p728_p13 = pnand %p727_p11, %p721_p5 }
  0x2e   : > { %731 = shalt.err (!%p728_p13)
}
  0x2f   : > { %s810_s16 = smov 32   ;;  %s811_s17 = smov 2  }
  0x30   : > { %666 = dma.hbm_to_vmem [thread:$0]  (!%p870_p10), %s1104_s2, 768, %s862_s24, [#allocation7], %s810_s16, %s810_s16, %s811_s17  }
  0x31   : > { %s732_s22 = scalar_lea.hbm %s1103_s1, 196608 }
  0x32   : > { %p733_p0 = scmp.ne.s32.totalorder %s1103_s1, %s732_s22  ;;  %p739_p3 = scmp.lt.u32.totalorder %s732_s22, %s1103_s1 }
  0x34   : > { %p735_p1 = pnand %p733_p0, %p884_p12 }
  0x36   : > { %p736_p2 = pneg %p735_p1 }
  0x38   : > { %p741_p4 = pnand %p739_p3, %p736_p2 }
  0x3a   : > { %744 = shalt.err (!%p741_p4)
}
  0x3b   : > { %s745_s24 = scalar_lea.vmem %s866_s28, 196608  ;;  %p753_p11 = scmp.lt.s32.totalorder %s866_s28, %s866_s28 }
  0x3c   : > { %p746_p5 = scmp.ne.s32.totalorder %s866_s28, %s745_s24  ;;  %p754_p13 = scmp.lt.s32.totalorder %s745_s24, %s745_s24 }
  0x3e   : > { %p748_p6 = pnand %p746_p5, %p884_p12  ;;  %p755_p0 = por %p754_p13, %p753_p11 }
  0x40   : > { %p749_p9 = pneg %p748_p6 }
  0x42   : > { %p756_p1 = pnand %p755_p0, %p749_p9 }
  0x44   : > { %759 = shalt.err (!%p756_p1)
}
  0x45   : > { %s812_s8 = smov 256   ;;  %s813_s9 = smov 16  }
  0x46   : > { %663 = dma.hbm_to_vmem [thread:$0]  (!%p870_p10), %s1103_s1, 196608, %s866_s28, [#allocation5], %s812_s8, %s812_s8, %s813_s9  }
  0x47   : > { %s760_s15 = scalar_lea.hbm %s1105_s3, 768 }
  0x48   : > { %p761_p2 = scmp.ne.s32.totalorder %s1105_s3, %s760_s15  ;;  %p767_p5 = scmp.lt.u32.totalorder %s760_s15, %s1105_s3 }
  0x4a   : > { %p763_p3 = pnand %p761_p2, %p884_p12 }
  0x4c   : > { %p764_p4 = pneg %p763_p3 }
  0x4e   : > { %p769_p6 = pnand %p767_p5, %p764_p4 }
  0x50   : > { %772 = shalt.err (!%p769_p6)
}
  0x51   : > { %s773_s22 = scalar_lea.vmem %s182_s6, 768  ;;  %p781_p0 = scmp.lt.s32.totalorder %s182_s6, %s182_s6 }
  0x52   : > { %p774_p9 = scmp.ne.s32.totalorder %s182_s6, %s773_s22  ;;  %p782_p1 = scmp.lt.s32.totalorder %s773_s22, %s773_s22 }
  0x54   : > { %p776_p11 = pnand %p774_p9, %p884_p12  ;;  %p783_p7 = por %p782_p1, %p781_p0 }
  0x56   : > { %p777_p13 = pneg %p776_p11 }
  0x58   : > { %p784_p8 = pnand %p783_p7, %p777_p13 }
  0x5a   : > { %787 = shalt.err (!%p784_p8)
}
  0x5b   : > { %669 = dma.hbm_to_vmem [thread:$0]  (!%p870_p10), %s1105_s3, 768, %s182_s6, [#allocation7], %s810_s16, %s810_s16, %s811_s17  }
  0x5c   : > { %p1113_p2 = scmp.ne.s32.totalorder %s1110_s26, 0 }
  0x5d   : > { %p1114_p12 = scmp.eq.s32.totalorder (!%p1113_p2), %s853_s25, 0 }
  0x5e   : > { %205 = sbr.rel (%p1113_p2) target bundleno = 399 (0x18f), region = 36 }
  0x65   : > { %795 = dma.done.wait (%p1114_p12), [#allocation5], 196608   ;;  %p1115_p3 = pmov %p1114_p12 }
  0x67   : > { %797 = vsyncadd (%p1115_p3), [#allocation5], 4294770688  ;;  %p1116_p7 = pmov %p1115_p3 }
  0x68   : > { %p1117_p8 = pmov %p1115_p3 }
  0x69   : > { %799 = dma.done.wait (%p1116_p7), [#allocation7], 1536  }
  0x6a   : > { %801 = vsyncadd (%p1117_p8), [#allocation7], 4294965760  ;;  %p239_p4 = scmp.lt.s32.totalorder %s853_s25, 1  ;;  %s965_s29 = sld [smem:[#allocation3 + %s853_s25]]  ;;  %v325_v27 = vlaneseq }
  0x6c   : > { %s1119_s25 = smov (!%p239_p4, %s853_s25), 1  ;;  %v1011_v34 = vshrl.u32 %v325_v27, 7 }
  0x6d   : > { %s549_s26 = sshll.u32 %s1119_s25, 5 }
  0x6e   : > { %s976_s16 = scalar_lea.vmem %s1106_s4, %s549_s26  ;;  %v331_v41 = vsub.s32 1, %v1011_v34  ;;  %v327_v42 = vsub.s32 0, %v1011_v34  ;;  %s248_s10 = scalar_lea.vmem %s1107_s5, %s549_s26 }
  0x6f   : > { %v980_v0 = vld [vmem:[%s976_s16 + $0x8] sm:$0xff]  ;;  %v983_v1 = vld [vmem:[%s976_s16 + $0x18] sm:$0xf]  ;;  %v1031_v53 = vld [vmem:[%s976_s16] sm:$0xff] }
  0x70   : > { %s551_s17 = sshll.u32 %s965_s29, 9  ;;  %399 = vmatprep.mubr.f32.mxu0 %v980_v0  ;;  %405 = vmatprep.mubr.f32.mxu1 %v983_v1  ;;  %s546_s30 = sshll.u32 %s965_s29, 1  ;;  %v1043_v57 = vld [vmem:[%s976_s16 + $0x10] sm:$0xf] }
  0x71   : > { %s987_s27 = scalar_lea.vmem [#allocation4], %s551_s17  ;;  %s412_s7 = scalar_lea.vmem [#allocation8], %s546_s30 }
  0x72   : > { %v258_v2 = vld [vmem:[%s987_s27 + $0x8] sm:$0xff]  ;;  %v260_v3 = vld [vmem:[%s987_s27 + $0x18] sm:$0xff]  ;;  %v257_v4 = vld [vmem:[%s987_s27] sm:$0xff]  ;;  %s322_s24 = scalar_lea.vmem [#allocation6], %s546_s30 }
  0x73   : > { %v552_v5 = vpack.c.bf16 %v260_v3, %v258_v2  ;;  %v259_v6 = vld [vmem:[%s987_s27 + $0x10] sm:$0xff]  ;;  %v262_v7 = vld [vmem:[%s987_s27 + $0x28] sm:$0xff]  ;;  %v264_v8 = vld [vmem:[%s987_s27 + $0x38] sm:$0xff] }
  0x74   : > { %v554_v9 = vpack.c.bf16 %v259_v6, %v257_v4  ;;  %v556_v10 = vpack.c.bf16 %v264_v8, %v262_v7  ;;  %v261_v11 = vld [vmem:[%s987_s27 + $0x20] sm:$0xff]  ;;  %v263_v12 = vld [vmem:[%s987_s27 + $0x30] sm:$0xff]  ;;  %v266_v13 = vld [vmem:[%s987_s27 + $0x48] sm:$0xff] }
  0x75   : > { %553 = vmatprep.subr.bf16.mxu0 %v552_v5  ;;  %616 = vmatprep.subr.bf16.mxu1 %v552_v5  ;;  %v268_v14 = vld [vmem:[%s987_s27 + $0x58] sm:$0xff]  ;;  %v558_v15 = vpack.c.bf16 %v263_v12, %v261_v11  ;;  %v265_v17 = vld [vmem:[%s987_s27 + $0x40] sm:$0xff]  ;;  %v267_v18 = vld [vmem:[%s987_s27 + $0x50] sm:$0xff] }
  0x76   : > { %555 = vmatpush1.bf16.msra.mxu0 %v554_v9  ;;  %632 = vmatpush1.bf16.msra.mxu1 %v554_v9  ;;  %v560_v16 = vpack.c.bf16 %v268_v14, %v266_v13  ;;  %v270_v19 = vld [vmem:[%s987_s27 + $0x68] sm:$0xff]  ;;  %v272_v20 = vld [vmem:[%s987_s27 + $0x78] sm:$0xff]  ;;  %v562_v21 = vpack.c.bf16 %v267_v18, %v265_v17  ;;  %v269_v23 = vld [vmem:[%s987_s27 + $0x60] sm:$0xff] }
  0x77   : > { %557 = vmatprep.subr.bf16.mxu0 %v556_v10  ;;  %617 = vmatprep.subr.bf16.mxu1 %v556_v10  ;;  %v564_v22 = vpack.c.bf16 %v272_v20, %v270_v19  ;;  %v271_v24 = vld [vmem:[%s987_s27 + $0x70] sm:$0xff]  ;;  %v274_v25 = vld [vmem:[%s987_s27 + $0x88] sm:$0xff]  ;;  %v276_v26 = vld [vmem:[%s987_s27 + $0x98] sm:$0xff] }
  0x78   : > { %v566_v28 = vpack.c.bf16 %v271_v24, %v269_v23  ;;  %v568_v29 = vpack.c.bf16 %v276_v26, %v274_v25  ;;  %v273_v30 = vld [vmem:[%s987_s27 + $0x80] sm:$0xff]  ;;  %v275_v31 = vld [vmem:[%s987_s27 + $0x90] sm:$0xff]  ;;  %v278_v32 = vld [vmem:[%s987_s27 + $0xa8] sm:$0xff] }
  0x79   : > { %v280_v33 = vld [vmem:[%s987_s27 + $0xb8] sm:$0xff]  ;;  %v570_v35 = vpack.c.bf16 %v275_v31, %v273_v30  ;;  %v277_v37 = vld [vmem:[%s987_s27 + $0xa0] sm:$0xff]  ;;  %v279_v38 = vld [vmem:[%s987_s27 + $0xb0] sm:$0xff] }
  0x7a   : > { %559 = vmatpush1.bf16.msra.mxu0 %v558_v15  ;;  %633 = vmatpush1.bf16.msra.mxu1 %v558_v15  ;;  %v572_v36 = vpack.c.bf16 %v280_v33, %v278_v32  ;;  %v282_v39 = vld [vmem:[%s987_s27 + $0xc8] sm:$0xff]  ;;  %v284_v40 = vld [vmem:[%s987_s27 + $0xd8] sm:$0xff]  ;;  %v574_v43 = vpack.c.bf16 %v279_v38, %v277_v37  ;;  %v281_v44 = vld [vmem:[%s987_s27 + $0xc0] sm:$0xff] }
  0x7b   : > { %561 = vmatprep.subr.bf16.mxu0 %v560_v16  ;;  %618 = vmatprep.subr.bf16.mxu1 %v560_v16  ;;  %v283_v45 = vld [vmem:[%s987_s27 + $0xd0] sm:$0xff]  ;;  %v576_v46 = vpack.c.bf16 %v284_v40, %v282_v39  ;;  %v413_v47 = vld [vmem:[%s412_s7] sm:$0x3]  ;;  %v286_v48 = vld [vmem:[%s987_s27 + $0xe8] sm:$0xff] }
  0x7c   : > { %v288_v49 = vld [vmem:[%s987_s27 + $0xf8] sm:$0xff]  ;;  %v422_v50 = vrot.slane %v413_v47, %v331_v41  ;;  %v418_v51 = vrot.slane %v413_v47, %v327_v42  ;;  %v578_v52 = vpack.c.bf16 %v283_v45, %v281_v44  ;;  %v285_v59 = vld [vmem:[%s987_s27 + $0xe0] sm:$0xff]  ;;  %v287_v60 = vld [vmem:[%s987_s27 + $0xf0] sm:$0xff] }
  0x7d   : > { %v580_v58 = vpack.c.bf16 %v288_v49, %v286_v48  ;;  %v290_v62 = vld [vmem:[%s987_s27 + $0x108] sm:$0xff]  ;;  %v292_v63 = vld [vmem:[%s987_s27 + $0x118] sm:$0xff]  ;;  %v289_v2 = vld [vmem:[%s987_s27 + $0x100] sm:$0xff] }
  0x7e   : > { %563 = vmatpush1.bf16.msra.mxu0 %v562_v21  ;;  %634 = vmatpush1.bf16.msra.mxu1 %v562_v21  ;;  %v1034_v54 = vmul.f32 %v422_v50, %v980_v0  ;;  %v1037_v55 = vmul.f32 %v422_v50, %v983_v1  ;;  %v1040_v56 = vmul.f32 %v418_v51, %v1031_v53  ;;  %v291_v3 = vld [vmem:[%s987_s27 + $0x110] sm:$0xff]  ;;  %v294_v4 = vld [vmem:[%s987_s27 + $0x128] sm:$0xff]  ;;  %v296_v5 = vld [vmem:[%s987_s27 + $0x138] sm:$0xff] }
  0x7f   : > { %565 = vmatprep.subr.bf16.mxu0 %v564_v22  ;;  %619 = vmatprep.subr.bf16.mxu1 %v564_v22  ;;  %v1048_v61 = vmul.f32 %v418_v51, %v1043_v57  ;;  %v582_v0 = vpack.c.bf16 %v287_v60, %v285_v59  ;;  %v584_v1 = vpack.c.bf16 %v292_v63, %v290_v62  ;;  %v293_v8 = vld [vmem:[%s987_s27 + $0x120] sm:$0xff]  ;;  %v295_v9 = vld [vmem:[%s987_s27 + $0x130] sm:$0xff]  ;;  %v298_v10 = vld [vmem:[%s987_s27 + $0x148] sm:$0xff] }
  0x80   : > { %v586_v6 = vpack.c.bf16 %v291_v3, %v289_v2  ;;  %v588_v7 = vpack.c.bf16 %v296_v5, %v294_v4  ;;  %v300_v11 = vld [vmem:[%s987_s27 + $0x158] sm:$0xff]  ;;  %v590_v12 = vpack.c.bf16 %v295_v9, %v293_v8  ;;  %v297_v14 = vld [vmem:[%s987_s27 + $0x140] sm:$0xff]  ;;  %v299_v15 = vld [vmem:[%s987_s27 + $0x150] sm:$0xff] }
  0x81   : > { %v592_v13 = vpack.c.bf16 %v300_v11, %v298_v10  ;;  %v302_v16 = vld [vmem:[%s987_s27 + $0x168] sm:$0xff]  ;;  %v304_v17 = vld [vmem:[%s987_s27 + $0x178] sm:$0xff]  ;;  %v594_v18 = vpack.c.bf16 %v299_v15, %v297_v14  ;;  %v301_v20 = vld [vmem:[%s987_s27 + $0x160] sm:$0xff] }
  0x82   : > { %567 = vmatpush1.bf16.msra.mxu0 %v566_v28  ;;  %635 = vmatpush1.bf16.msra.mxu1 %v566_v28  ;;  %v596_v19 = vpack.c.bf16 %v304_v17, %v302_v16  ;;  %v303_v21 = vld [vmem:[%s987_s27 + $0x170] sm:$0xff]  ;;  %v306_v22 = vld [vmem:[%s987_s27 + $0x188] sm:$0xff]  ;;  %v308_v23 = vld [vmem:[%s987_s27 + $0x198] sm:$0xff] }
  0x83   : > { %569 = vmatprep.subr.bf16.mxu0 %v568_v29  ;;  %620 = vmatprep.subr.bf16.mxu1 %v568_v29  ;;  %v598_v24 = vpack.c.bf16 %v303_v21, %v301_v20  ;;  %v600_v25 = vpack.c.bf16 %v308_v23, %v306_v22  ;;  %v305_v26 = vld [vmem:[%s987_s27 + $0x180] sm:$0xff]  ;;  %v307_v27 = vld [vmem:[%s987_s27 + $0x190] sm:$0xff]  ;;  %v310_v28 = vld [vmem:[%s987_s27 + $0x1a8] sm:$0xff] }
  0x84   : > { %v312_v29 = vld [vmem:[%s987_s27 + $0x1b8] sm:$0xff]  ;;  %v602_v30 = vpack.c.bf16 %v307_v27, %v305_v26  ;;  %v309_v32 = vld [vmem:[%s987_s27 + $0x1a0] sm:$0xff]  ;;  %v311_v33 = vld [vmem:[%s987_s27 + $0x1b0] sm:$0xff] }
  0x85   : > { %v604_v31 = vpack.c.bf16 %v312_v29, %v310_v28  ;;  %v606_v37 = vpack.c.bf16 %v311_v33, %v309_v32  ;;  %v313_v39 = vld [vmem:[%s987_s27 + $0x1c0] sm:$0xff]  ;;  %v315_v40 = vld [vmem:[%s987_s27 + $0x1d0] sm:$0xff]  ;;  %v320_v44 = vld [vmem:[%s987_s27 + $0x1f8] sm:$0xff] }
  0x86   : > { %571 = vmatpush1.bf16.msra.mxu0 %v570_v35  ;;  %636 = vmatpush1.bf16.msra.mxu1 %v570_v35  ;;  %v314_v35 = vld [vmem:[%s987_s27 + $0x1c8] sm:$0xff]  ;;  %v610_v45 = vpack.c.bf16 %v315_v40, %v313_v39  ;;  %v317_v47 = vld [vmem:[%s987_s27 + $0x1e0] sm:$0xff]  ;;  %v319_v48 = vld [vmem:[%s987_s27 + $0x1f0] sm:$0xff] }
  0x87   : > { %573 = vmatprep.subr.bf16.mxu0 %v572_v36  ;;  %621 = vmatprep.subr.bf16.mxu1 %v572_v36  ;;  %v316_v36 = vld [vmem:[%s987_s27 + $0x1d8] sm:$0xff]  ;;  %v614_v49 = vpack.c.bf16 %v319_v48, %v317_v47  ;;  %v323_v50 = vld [vmem:[%s322_s24] sm:$0x3] }
  0x88   : > { %v608_v38 = vpack.c.bf16 %v316_v36, %v314_v35  ;;  %v328_v51 = vrot.slane %v323_v50, %v327_v42 }
  0x8a   : > { %575 = vmatpush1.bf16.msra.mxu0 %v574_v43  ;;  %637 = vmatpush1.bf16.msra.mxu1 %v574_v43  ;;  %v318_v43 = vld [vmem:[%s987_s27 + $0x1e8] sm:$0xff] }
  0x8b   : > { %577 = vmatprep.subr.bf16.mxu0 %v576_v46  ;;  %622 = vmatprep.subr.bf16.mxu1 %v576_v46  ;;  %v612_v46 = vpack.c.bf16 %v320_v44, %v318_v43 }
  0x8e   : > { %579 = vmatpush1.bf16.msra.mxu0 %v578_v52  ;;  %638 = vmatpush1.bf16.msra.mxu1 %v578_v52  ;;  %v332_v52 = vrot.slane %v323_v50, %v331_v41 }
  0x8f   : > { %581 = vmatprep.subr.bf16.mxu0 %v580_v58  ;;  %623 = vmatprep.subr.bf16.mxu1 %v580_v58 }
  0x92   : > { %583 = vmatpush1.bf16.msra.mxu0 %v582_v0  ;;  %639 = vmatpush1.bf16.msra.mxu1 %v582_v0 }
  0x93   : > { %585 = vmatprep.subr.bf16.mxu0 %v584_v1  ;;  %624 = vmatprep.subr.bf16.mxu1 %v584_v1 }
  0x96   : > { %587 = vmatpush1.bf16.msra.mxu0 %v586_v6  ;;  %640 = vmatpush1.bf16.msra.mxu1 %v586_v6 }
  0x97   : > { %589 = vmatprep.subr.bf16.mxu0 %v588_v7  ;;  %625 = vmatprep.subr.bf16.mxu1 %v588_v7 }
  0x9a   : > { %591 = vmatpush1.bf16.msra.mxu0 %v590_v12  ;;  %641 = vmatpush1.bf16.msra.mxu1 %v590_v12 }
  0x9b   : > { %593 = vmatprep.subr.bf16.mxu0 %v592_v13  ;;  %626 = vmatprep.subr.bf16.mxu1 %v592_v13 }
  0x9e   : > { %595 = vmatpush1.bf16.msra.mxu0 %v594_v18  ;;  %642 = vmatpush1.bf16.msra.mxu1 %v594_v18 }
  0x9f   : > { %597 = vmatprep.subr.bf16.mxu0 %v596_v19  ;;  %627 = vmatprep.subr.bf16.mxu1 %v596_v19 }
  0xa2   : > { %599 = vmatpush1.bf16.msra.mxu0 %v598_v24  ;;  %643 = vmatpush1.bf16.msra.mxu1 %v598_v24 }
  0xa3   : > { %601 = vmatprep.subr.bf16.mxu0 %v600_v25  ;;  %628 = vmatprep.subr.bf16.mxu1 %v600_v25 }
  0xa6   : > { %603 = vmatpush1.bf16.msra.mxu0 %v602_v30  ;;  %644 = vmatpush1.bf16.msra.mxu1 %v602_v30 }
  0xa7   : > { %605 = vmatprep.subr.bf16.mxu0 %v604_v31  ;;  %629 = vmatprep.subr.bf16.mxu1 %v604_v31 }
  0xaa   : > { %607 = vmatpush1.bf16.msra.mxu0 %v606_v37  ;;  %645 = vmatpush1.bf16.msra.mxu1 %v606_v37 }
  0xab   : > { %609 = vmatprep.subr.bf16.mxu0 %v608_v38  ;;  %630 = vmatprep.subr.bf16.mxu1 %v608_v38 }
  0xae   : > { %611 = vmatpush1.bf16.msra.mxu0 %v610_v45  ;;  %646 = vmatpush1.bf16.msra.mxu1 %v610_v45 }
  0xaf   : > { %613 = vmatprep.subr.bf16.mxu0 %v612_v46  ;;  %631 = vmatprep.subr.bf16.mxu1 %v612_v46 }
  0xb2   : > { %615 = vmatpush1.bf16.msra.mxu0 %v614_v49  ;;  %647 = vmatpush1.bf16.msra.mxu1 %v614_v49 }
  0xb5   : > { %400 = vmatmul.mubr.f32.vlgmr.msra.gmra.mrb[0].mxu0 %v1031_v53  ;;  %406 = vmatmul.mubr.f32.vlgmr.msra.gmra.mrb[0].mxu1 %v1043_v57 }
 0x188   : > { %v401_v58 = vpop.f32.mrb[0].mxu0  ;;  %v407_v59 = vpop.f32.mrb[0].mxu1 }
 0x189   : > { %v402_v60 = vadd.f32 %v401_v58, %v328_v51  ;;  %v408_v62 = vadd.f32 %v407_v59, %v328_v51  ;;  %v403_v63 = vpop.f32.mrb[1].mxu0  ;;  %v409_v0 = vpop.f32.mrb[1].mxu1 }
 0x18a   : > { %v404_v53 = vadd.f32 %v403_v63, %v332_v52  ;;  %v410_v57 = vadd.f32 %v409_v0, %v332_v52 }
 0x18b   : > { %v429_v1 = vadd.f32 %v1040_v56, %v402_v60  ;;  %v431_v42 = vadd.f32 %v1048_v61, %v408_v62 }
 0x18c   : > { %v430_v34 = vadd.f32 %v1034_v54, %v404_v53  ;;  %v432_v41 = vadd.f32 %v1037_v55, %v410_v57 }
 0x18d   : > { %433 = vst [vmem:[%s248_s10] sm:$0xff] %v429_v1  ;;  %435 = vst [vmem:[%s248_s10 + $0x10] sm:$0xf] %v431_v42 }
 0x18e   : > { %434 = vst [vmem:[%s248_s10 + $0x8] sm:$0xff] %v430_v34  ;;  %436 = vst [vmem:[%s248_s10 + $0x18] sm:$0xf] %v432_v41 }
 0x18f PF: > { %s23_s23 = sadd.s32 1, %s804_s23  }
 0x190   : > { %p20_p10 = scmp.ge.s32.totalorder %s23_s23, 4  }
 0x192   :  { %22 = sbr.rel (!%p20_p10) target bundleno = 17 (0x11), region = 82 }
 0x199   :  { %458 = vsyncpa [#allocation5], 1 }
 0x19a   :  { %460 = vsyncpa [#allocation5 + $0x1], 1 }
 0x19b   :  { %461 = vsyncpa [#allocation7], 1 }

</bundles_post_ra>
